<compile_context>
chip_gen: v7x
topology: tpu7x:2x2x1
jax: 0.10.0
libtpu: 0.0.40
codegen_flags: <defaults>
</compile_context>

<pallas_src>
import functools

import jax
import jax.numpy as jnp
from jax.experimental import pallas as pl
from jax.experimental.pallas import tpu as pltpu


def factor2_kernel(x_ref, w1_ref, b1_ref, w2_ref, b2_ref, o_ref):
    # x_ref: (tm, nfeat)    w1_ref: (nfeat, nmid)   b1_ref: (1, nmid)
    # w2_ref: (nmid, nhid)  b2_ref: (1, nhid)       o_ref: (tm, nhid)
    h = jnp.dot(x_ref[...], w1_ref[...], preferred_element_type=jnp.float32)
    h = jnp.maximum(h + b1_ref[...].astype(jnp.float32), 0.0)  # bias + ReLU in f32
    # Feed the f32 accumulator straight into the second matmul (no down-cast).
    out = jnp.dot(h, w2_ref[...], preferred_element_type=jnp.float32)
    out = out + b2_ref[...].astype(jnp.float32)
    o_ref[...] = out.astype(o_ref.dtype)


def _resident_spec(shape):
    """Spec for a block identical at every grid step (weights / biases).

    Constant index_map => fetched once; Buffered(1) => no wasted second buffer.
    """
    return pl.BlockSpec(shape, lambda i: (0,) * len(shape),
                        pipeline_mode=pl.Buffered(1))


@functools.partial(jax.jit, static_argnames=("tm",))
def factor2_forward(x, w1, b1, w2, b2, *, tm=512):
    """relu(x @ w1 + b1) @ w2 + b2  == Factor2.forward (weights pre-transposed)."""
    N, nfeat = x.shape
    nmid = w1.shape[1]
    nhid = w2.shape[1]

    # Row tiling.  tm must be sublane (8) aligned; if N fits in one tile, take
    # the whole array as a single block (block dim == full array dim is legal
    # regardless of alignment).  Ragged last tiles are handled by Pallas.
    assert tm % 8 == 0, "row tile must be sublane (8) aligned"
    if N <= tm:
        tm_eff = N
        grid = (1,)
    else:
        tm_eff = tm
        grid = (pl.cdiv(N, tm_eff),)

    itemsize = jnp.dtype(x.dtype).itemsize
    cost = pl.CostEstimate(
        flops=2 * N * (nfeat * nmid + nmid * nhid),
        transcendentals=0,
        bytes_accessed=(N * nfeat + N * nhid) * itemsize
        + (w1.size + b1.size + w2.size + b2.size) * jnp.dtype(w1.dtype).itemsize,
    )

    return pl.pallas_call(
        factor2_kernel,
        out_shape=jax.ShapeDtypeStruct((N, nhid), x.dtype),
        grid_spec=pltpu.PrefetchScalarGridSpec(
            num_scalar_prefetch=0,
            grid=grid,
            in_specs=[
                pl.BlockSpec((tm_eff, nfeat), lambda i: (i, 0)),  # streamed x tile
                _resident_spec((nfeat, nmid)),                    # W1 (resident)
                _resident_spec((1, nmid)),                        # b1 (resident)
                _resident_spec((nmid, nhid)),                     # W2 (resident)
                _resident_spec((1, nhid)),                        # b2 (resident)
            ],
            out_specs=pl.BlockSpec((tm_eff, nhid), lambda i: (i, 0)),
        ),
        compiler_params=pltpu.CompilerParams(
            dimension_semantics=("parallel",),
        ),
        cost_estimate=cost,
    )(x, w1, b1, w2, b2)


def init_params(key, nfeat, nmid, nhid, dtype=jnp.float32):
    """Deterministic synthetic init mimicking nn.Linear's U(-1/sqrt(in), 1/sqrt(in))."""
    k1, k2, k3, k4 = jax.random.split(key, 4)
    bound1 = 1.0 / jnp.sqrt(nfeat)
    bound2 = 1.0 / jnp.sqrt(nmid)
    w1 = jax.random.uniform(k1, (nfeat, nmid), dtype, -bound1, bound1)
    b1 = jax.random.uniform(k2, (1, nmid), dtype, -bound1, bound1)
    w2 = jax.random.uniform(k3, (nmid, nhid), dtype, -bound2, bound2)
    b2 = jax.random.uniform(k4, (1, nhid), dtype, -bound2, bound2)
    return w1, b1, w2, b2


if __name__ == "__main__":
    # Factor2(nfeat=32, nmid=64, nhid=16) applied to a batch of N node features.
    # N=1024 with tm=512 -> grid of 2 (keeps both v7x TensorCores busy).
    N, nfeat, nmid, nhid = 1024, 32, 64, 16

    key = jax.random.PRNGKey(0)
    kx, kp = jax.random.split(key)
    x = jax.random.normal(kx, (N, nfeat), jnp.float32)
    w1, b1, w2, b2 = init_params(kp, nfeat, nmid, nhid)

    out = factor2_forward(x, w1, b1, w2, b2, tm=512)
    out = jax.block_until_ready(out)

    # Pure-JAX reference check of the forward semantics.
    ref = jnp.maximum(x @ w1 + b1, 0.0) @ w2 + b2
    assert out.shape == (N, nhid)
    assert jnp.allclose(out, ref, atol=1e-5, rtol=1e-5), "mismatch vs reference"

    print("KERNEL_OK")
</pallas_src>

<mosaic_0001>
module attributes {stable_mosaic.version = 11 : i64} {
  func.func @factor2_kernel(%arg0: i32, %arg1: memref<512x32xf32, #tpu.memory_space<vmem>>, %arg2: memref<32x64xf32, #tpu.memory_space<vmem>>, %arg3: memref<1x64xf32, #tpu.memory_space<vmem>>, %arg4: memref<64x16xf32, #tpu.memory_space<vmem>>, %arg5: memref<1x16xf32, #tpu.memory_space<vmem>>, %arg6: memref<512x16xf32, #tpu.memory_space<vmem>>) attributes {dimension_semantics = [#tpu.dimension_semantics<parallel>], iteration_bounds = array<i64: 2>, scalar_prefetch = 0 : i64, scratch_operands = 0 : i64, tpu.core_type = #tpu.core_type<tc>, window_params = [{transform_indices = @transform_0, window_bounds = array<i64: 512, 32>}, {pipeline_mode = #tpu.pipeline_mode<synchronous>, transform_indices = @transform_1, window_bounds = array<i64: 32, 64>}, {pipeline_mode = #tpu.pipeline_mode<synchronous>, transform_indices = @transform_2, window_bounds = array<i64: 1, 64>}, {pipeline_mode = #tpu.pipeline_mode<synchronous>, transform_indices = @transform_3, window_bounds = array<i64: 64, 16>}, {pipeline_mode = #tpu.pipeline_mode<synchronous>, transform_indices = @transform_4, window_bounds = array<i64: 1, 16>}, {transform_indices = @transform_5, window_bounds = array<i64: 512, 16>}]} {
    %c0 = arith.constant 0 : index
    %c0_0 = arith.constant 0 : index
    %0 = vector.load %arg1[%c0, %c0_0] : memref<512x32xf32, #tpu.memory_space<vmem>>, vector<512x32xf32>
    %c0_1 = arith.constant 0 : index
    %c0_2 = arith.constant 0 : index
    %1 = vector.load %arg2[%c0_1, %c0_2] : memref<32x64xf32, #tpu.memory_space<vmem>>, vector<32x64xf32>
    %cst = arith.constant dense<0.000000e+00> : vector<512x64xf32>
    %2 = tpu.matmul %0, %1, %cst {dimension_numbers = #tpu.dot_dimension_numbers<[1], [0], [0], [1], [0, 0, 1, 1], [], []>} : vector<512x32xf32>, vector<32x64xf32>, vector<512x64xf32> -> vector<512x64xf32>
    %c0_3 = arith.constant 0 : index
    %c0_4 = arith.constant 0 : index
    %3 = vector.load %arg3[%c0_3, %c0_4] : memref<1x64xf32, #tpu.memory_space<vmem>>, vector<1x64xf32>
    %4 = vector.broadcast %3 : vector<1x64xf32> to vector<512x64xf32>
    %5 = arith.addf %2, %4 : vector<512x64xf32>
    %cst_5 = arith.constant 0.000000e+00 : f32
    %6 = vector.broadcast %cst_5 : f32 to vector<512x64xf32>
    %7 = arith.maximumf %5, %6 : vector<512x64xf32>
    %c0_6 = arith.constant 0 : index
    %c0_7 = arith.constant 0 : index
    %8 = vector.load %arg4[%c0_6, %c0_7] : memref<64x16xf32, #tpu.memory_space<vmem>>, vector<64x16xf32>
    %cst_8 = arith.constant dense<0.000000e+00> : vector<512x16xf32>
    %9 = tpu.matmul %7, %8, %cst_8 {dimension_numbers = #tpu.dot_dimension_numbers<[1], [0], [0], [1], [0, 0, 1, 1], [], []>} : vector<512x64xf32>, vector<64x16xf32>, vector<512x16xf32> -> vector<512x16xf32>
    %c0_9 = arith.constant 0 : index
    %c0_10 = arith.constant 0 : index
    %10 = vector.load %arg5[%c0_9, %c0_10] : memref<1x16xf32, #tpu.memory_space<vmem>>, vector<1x16xf32>
    %11 = vector.broadcast %10 : vector<1x16xf32> to vector<512x16xf32>
    %12 = arith.addf %9, %11 : vector<512x16xf32>
    %c0_11 = arith.constant 0 : index
    %c0_12 = arith.constant 0 : index
    %13 = vector.load %arg6[%c0_11, %c0_12] : memref<512x16xf32, #tpu.memory_space<vmem>>, vector<512x16xf32>
    tpu.vector_store %arg6[%c0_11, %c0_12], %12 {strides = array<i32>} : memref<512x16xf32, #tpu.memory_space<vmem>>, vector<512x16xf32>,
    return
  }
  func.func @transform_0(%arg0: i32) -> (i32, i32) {
    %c0_i32 = arith.constant 0 : i32
    %c0_i32_0 = arith.constant 0 : i32
    return %arg0, %c0_i32 : i32, i32
  }
  func.func @transform_1(%arg0: i32) -> (i32, i32) {
    %c0_i32 = arith.constant 0 : i32
    %c0_i32_0 = arith.constant 0 : i32
    %c0_i32_1 = arith.constant 0 : i32
    return %c0_i32, %c0_i32_0 : i32, i32
  }
  func.func @transform_2(%arg0: i32) -> (i32, i32) {
    %c0_i32 = arith.constant 0 : i32
    %c0_i32_0 = arith.constant 0 : i32
    %c0_i32_1 = arith.constant 0 : i32
    return %c0_i32, %c0_i32_0 : i32, i32
  }
  func.func @transform_3(%arg0: i32) -> (i32, i32) {
    %c0_i32 = arith.constant 0 : i32
    %c0_i32_0 = arith.constant 0 : i32
    %c0_i32_1 = arith.constant 0 : i32
    return %c0_i32, %c0_i32_0 : i32, i32
  }
  func.func @transform_4(%arg0: i32) -> (i32, i32) {
    %c0_i32 = arith.constant 0 : i32
    %c0_i32_0 = arith.constant 0 : i32
    %c0_i32_1 = arith.constant 0 : i32
    return %c0_i32, %c0_i32_0 : i32, i32
  }
  func.func @transform_5(%arg0: i32) -> (i32, i32) {
    %c0_i32 = arith.constant 0 : i32
    %c0_i32_0 = arith.constant 0 : i32
    return %arg0, %c0_i32 : i32, i32
  }
}

</mosaic_0001>

<bundles_post_ra>
// kernel: factor2_forward.1
= control target key start
LH: loop header
LB: loop body
LE: loop exit
PB: predicated region body
PF: predicated region fallthrough
CT: control target
= control target key end

     0   :  { %s2234_s18 = smov 0   ;;  %s2756_s0 = inlined_call_operand.vmem [shape: f32[1024,32], index: 0, kind: input, shape index: {}]   ;;  %s2757_s1 = inlined_call_operand.vmem [shape: f32[32,64], index: 1, kind: input, shape index: {}]   ;;  %s2758_s2 = inlined_call_operand.vmem [shape: f32[1,64], index: 2, kind: input, shape index: {}]   ;;  %s2759_s3 = inlined_call_operand.vmem [shape: f32[64,16], index: 3, kind: input, shape index: {}]   ;;  %s2760_s4 = inlined_call_operand.vmem [shape: f32[1,16], index: 4, kind: input, shape index: {}]   ;;  %s2761_s5 = inlined_call_operand.vmem [shape: f32[1024,16], index: 5, kind: output, shape index: {}]  }
   0x1 LB: > { %s1659_s19 = sadd.s32 4294967295, %s2202_s18   ;;  %p1663_p0 = scmp.ge.s32.totalorder %s2202_s18, 1  ;;  %s2202_s18 = sphi %s2234_s18, %s15_s18  }
   0x2   : > { %p188_p1 = scmp.lt.s32.totalorder %s2202_s18, 3 }
   0x4   : > { %p189_p2 = pnand %p1663_p0, %p188_p1 }
   0x5   : > { %v292_v0 = vld [vmem:[%s2757_s1] sm:$0xff] (!%p189_p2)  ;;  %v293_v1 = vld [vmem:[%s2757_s1 + $0x8] sm:$0xff] (!%p189_p2)  ;;  %v294_v2 = vld [vmem:[%s2757_s1 + $0x10] sm:$0xff] (!%p189_p2)  ;;  %s1664_s26 = sshll.u32 (!%p189_p2), %s1659_s19, 6  ;;  %vm303_vm0 = vcmask (!%p189_p2), 261120   ;;  %vm960_vm1 = vcmask (!%p189_p2), 523264  }
   0x6   : > { %192 = sbr.rel (%p189_p2) target bundleno = 576 (0x240), region = 40  ;;  %v2156_v3 = vpack.c.bf16 (!%p189_p2), %v293_v1, %v292_v0  ;;  %v295_v4 = vld [vmem:[%s2757_s1 + $0x18] sm:$0xff] (!%p189_p2)  ;;  %p217_p3 = scmp.lt.s32.totalorder (!%p189_p2), %s1664_s26, 127  ;;  %v945_v18 = vld [vmem:[%s2759_s3] sm:$0xff] (!%p189_p2)  ;;  %v946_v19 = vld [vmem:[%s2759_s3 + $0x8] sm:$0xff] (!%p189_p2)  ;;  %vm1538_vm2 = vcmask (!%p189_p2), 130048  }
   0x7   : > { %v2160_v5 = vpack.c.bf16 (!%p189_p2), %v295_v4, %v294_v2  ;;  %v2164_v21 = vpack.c.bf16 (!%p189_p2), %v946_v19, %v945_v18  ;;  %v947_v22 = vld [vmem:[%s2759_s3 + $0x10] sm:$0xff] (!%p189_p2)  ;;  %v948_v23 = vld [vmem:[%s2759_s3 + $0x18] sm:$0xff] (!%p189_p2)  ;;  %v949_v25 = vld [vmem:[%s2759_s3 + $0x20] sm:$0xff] (!%p189_p2) }
   0x8   : > { %2157 = vmatprep.subr.bf16.mxu0 (!%p189_p2), %v2156_v3  ;;  %v2168_v24 = vpack.c.bf16 (!%p189_p2), %v948_v23, %v947_v22  ;;  %v950_v26 = vld [vmem:[%s2759_s3 + $0x28] sm:$0xff] (!%p189_p2)  ;;  %v951_v60 = vld [vmem:[%s2759_s3 + $0x30] sm:$0xff] (!%p189_p2)  ;;  %v952_v61 = vld [vmem:[%s2759_s3 + $0x38] sm:$0xff] (!%p189_p2) }
   0x9   : > { %2159 = vmatpush3.bf16.msra.mxu0 (!%p189_p2), %v2156_v3  ;;  %2180 = vmatprep.subr.bf16.mxu1 (!%p189_p2), %v2164_v21  ;;  %v2172_v29 = vpack.c.bf16 (!%p189_p2), %v950_v26, %v949_v25  ;;  %v2176_v62 = vpack.c.bf16 (!%p189_p2), %v952_v61, %v951_v60  ;;  %v2419_v18 = vld [vmem:[%s2758_s2] ss:$0 sm:$0xff] (!%p189_p2) }
   0xa   : > { %2161 = vmatprep.subr.bf16.mxu0 (!%p189_p2), %v2160_v5  ;;  %2184 = vmatpush3.bf16.msra.mxu1 (!%p189_p2), %v2164_v21 }
   0xb   : > { %2181 = vmatprep.subr.bf16.mxu1 (!%p189_p2), %v2168_v24 }
   0xd   : > { %s2763_s26 = smov (!%p217_p3, %s1664_s26), 127  ;;  %2163 = vmatpush3.bf16.msra.mxu0 %v2160_v5 }
   0xe   : > { %s1665_s29 = sshll.u32 %s2763_s26, 3  ;;  %2165 = vmatprep.subr.bf16.mxu0 %v2164_v21  ;;  %2185 = vmatpush3.bf16.msra.mxu1 %v2168_v24 }
   0xf   : > { %s2262_s7 = scalar_lea.vmem %s2756_s0, %s1665_s29  ;;  %2182 = vmatprep.subr.bf16.mxu1 %v2172_v29  ;;  %s2559_s8 = scalar_lea.vmem %s2761_s5, %s1665_s29 }
  0x10   : > { %v228_v6 = vld [vmem:[%s2262_s7] sm:$0xff]  ;;  %v229_v7 = vld [vmem:[%s2262_s7 + $0x8] sm:$0xff]  ;;  %v230_v8 = vld [vmem:[%s2262_s7 + $0x10] sm:$0xff] }
  0x11   : > { %1948 = vmatprep.mubr.msk.f32.mxu0 %vm303_vm0, %v228_v6  ;;  %v231_v9 = vld [vmem:[%s2262_s7 + $0x18] sm:$0xff]  ;;  %v232_v10 = vld [vmem:[%s2262_s7 + $0x20] sm:$0xff]  ;;  %v233_v11 = vld [vmem:[%s2262_s7 + $0x28] sm:$0xff] }
  0x12   : > { %1949 = vmatmul.mubr.msk.f32.vlgmr.msra.gmra.mrb[0].mxu0 %vm303_vm0, %v229_v7  ;;  %v234_v12 = vld [vmem:[%s2262_s7 + $0x30] sm:$0xff]  ;;  %v235_v13 = vld [vmem:[%s2262_s7 + $0x38] sm:$0xff]  ;;  %v236_v14 = vld [vmem:[%s2262_s7 + $0x40] sm:$0xff]  ;;  %2186 = vmatpush3.bf16.msra.mxu1 %v2172_v29 }
  0x13   : > { %1951 = vmatprep.mubr.msk.f32.mxu0 %vm303_vm0, %v230_v8  ;;  %v237_v15 = vld [vmem:[%s2262_s7 + $0x48] sm:$0xff]  ;;  %v238_v16 = vld [vmem:[%s2262_s7 + $0x50] sm:$0xff]  ;;  %v239_v17 = vld [vmem:[%s2262_s7 + $0x58] sm:$0xff]  ;;  %2167 = vmatpush3.bf16.msra.mxu0 %v2164_v21 }
  0x14   : > { %v240_v20 = vld [vmem:[%s2262_s7 + $0x60] sm:$0xff]  ;;  %v241_v27 = vld [vmem:[%s2262_s7 + $0x68] sm:$0xff]  ;;  %v242_v28 = vld [vmem:[%s2262_s7 + $0x70] sm:$0xff]  ;;  %2169 = vmatprep.subr.bf16.mxu0 %v2168_v24  ;;  %2183 = vmatprep.subr.bf16.mxu1 %v2176_v62 }
  0x15   : > { %v243_v30 = vld [vmem:[%s2262_s7 + $0x78] sm:$0xff]  ;;  %v244_v31 = vld [vmem:[%s2262_s7 + $0x80] sm:$0xff]  ;;  %v245_v32 = vld [vmem:[%s2262_s7 + $0x88] sm:$0xff] }
  0x16   : > { %1952 = vmatmul.mubr.msk.f32.gmra.mrb[2].mxu0 %vm303_vm0, %v231_v9  ;;  %v246_v33 = vld [vmem:[%s2262_s7 + $0x90] sm:$0xff]  ;;  %v247_v34 = vld [vmem:[%s2262_s7 + $0x98] sm:$0xff]  ;;  %v248_v35 = vld [vmem:[%s2262_s7 + $0xa0] sm:$0xff]  ;;  %2187 = vmatpush3.bf16.msra.mxu1 %v2176_v62 }
  0x17   : > { %1954 = vmatprep.mubr.msk.f32.mxu0 %vm303_vm0, %v232_v10  ;;  %2171 = vmatpush3.bf16.msra.mxu0 %v2168_v24  ;;  %v249_v36 = vld [vmem:[%s2262_s7 + $0xa8] sm:$0xff]  ;;  %v250_v37 = vld [vmem:[%s2262_s7 + $0xb0] sm:$0xff]  ;;  %v251_v38 = vld [vmem:[%s2262_s7 + $0xb8] sm:$0xff] }
  0x18   : > { %2173 = vmatprep.subr.bf16.mxu0 %v2172_v29  ;;  %v252_v39 = vld [vmem:[%s2262_s7 + $0xc0] sm:$0xff]  ;;  %v253_v40 = vld [vmem:[%s2262_s7 + $0xc8] sm:$0xff]  ;;  %v254_v41 = vld [vmem:[%s2262_s7 + $0xd0] sm:$0xff] }
  0x19   : > { %v255_v42 = vld [vmem:[%s2262_s7 + $0xd8] sm:$0xff]  ;;  %v256_v43 = vld [vmem:[%s2262_s7 + $0xe0] sm:$0xff]  ;;  %v257_v44 = vld [vmem:[%s2262_s7 + $0xe8] sm:$0xff] }
  0x1a   : > { %1955 = vmatmul.mubr.msk.f32.gmra.mrb[4].mxu0 %vm303_vm0, %v233_v11  ;;  %v258_v45 = vld [vmem:[%s2262_s7 + $0xf0] sm:$0xff]  ;;  %v259_v46 = vld [vmem:[%s2262_s7 + $0xf8] sm:$0xff]  ;;  %v260_v47 = vld [vmem:[%s2262_s7 + $0x100] sm:$0xff] }
  0x1b   : > { %1957 = vmatprep.mubr.msk.f32.mxu0 %vm303_vm0, %v234_v12  ;;  %2175 = vmatpush3.bf16.msra.mxu0 %v2172_v29  ;;  %v261_v48 = vld [vmem:[%s2262_s7 + $0x108] sm:$0xff]  ;;  %v262_v49 = vld [vmem:[%s2262_s7 + $0x110] sm:$0xff]  ;;  %v263_v50 = vld [vmem:[%s2262_s7 + $0x118] sm:$0xff] }
  0x1c   : > { %v264_v51 = vld [vmem:[%s2262_s7 + $0x120] sm:$0xff]  ;;  %v265_v52 = vld [vmem:[%s2262_s7 + $0x128] sm:$0xff]  ;;  %v266_v53 = vld [vmem:[%s2262_s7 + $0x130] sm:$0xff]  ;;  %2177 = vmatprep.subr.bf16.mxu0 %v2176_v62 }
  0x1d   : > { %v267_v54 = vld [vmem:[%s2262_s7 + $0x138] sm:$0xff]  ;;  %v268_v55 = vld [vmem:[%s2262_s7 + $0x140] sm:$0xff]  ;;  %v269_v56 = vld [vmem:[%s2262_s7 + $0x148] sm:$0xff] }
  0x1e   : > { %1958 = vmatmul.mubr.msk.f32.gmra.mrb[6].mxu0 %vm303_vm0, %v235_v13  ;;  %v270_v57 = vld [vmem:[%s2262_s7 + $0x150] sm:$0xff]  ;;  %v271_v58 = vld [vmem:[%s2262_s7 + $0x158] sm:$0xff]  ;;  %v272_v59 = vld [vmem:[%s2262_s7 + $0x160] sm:$0xff] }
  0x1f   : > { %1960 = vmatprep.mubr.msk.f32.mxu0 %vm303_vm0, %v236_v14  ;;  %v273_v63 = vld [vmem:[%s2262_s7 + $0x168] sm:$0xff]  ;;  %v274_v0 = vld [vmem:[%s2262_s7 + $0x170] sm:$0xff]  ;;  %2179 = vmatpush3.bf16.msra.mxu0 %v2176_v62  ;;  %v275_v1 = vld [vmem:[%s2262_s7 + $0x178] sm:$0xff] }
  0x20   : > { %v276_v2 = vld [vmem:[%s2262_s7 + $0x180] sm:$0xff]  ;;  %v277_v3 = vld [vmem:[%s2262_s7 + $0x188] sm:$0xff]  ;;  %v278_v4 = vld [vmem:[%s2262_s7 + $0x190] sm:$0xff] }
  0x21   : > { %v279_v5 = vld [vmem:[%s2262_s7 + $0x198] sm:$0xff]  ;;  %v280_v6 = vld [vmem:[%s2262_s7 + $0x1a0] sm:$0xff]  ;;  %v281_v7 = vld [vmem:[%s2262_s7 + $0x1a8] sm:$0xff] }
  0x22   : > { %1961 = vmatmul.mubr.msk.f32.gmra.mrb[8].mxu0 %vm303_vm0, %v237_v15  ;;  %v282_v8 = vld [vmem:[%s2262_s7 + $0x1b0] sm:$0xff]  ;;  %v283_v9 = vld [vmem:[%s2262_s7 + $0x1b8] sm:$0xff]  ;;  %v284_v10 = vld [vmem:[%s2262_s7 + $0x1c0] sm:$0xff] }
  0x23   : > { %1963 = vmatprep.mubr.msk.f32.mxu0 %vm303_vm0, %v238_v16  ;;  %v285_v11 = vld [vmem:[%s2262_s7 + $0x1c8] sm:$0xff]  ;;  %v286_v12 = vld [vmem:[%s2262_s7 + $0x1d0] sm:$0xff]  ;;  %v287_v13 = vld [vmem:[%s2262_s7 + $0x1d8] sm:$0xff] }
  0x24   : > { %v288_v14 = vld [vmem:[%s2262_s7 + $0x1e0] sm:$0xff]  ;;  %v289_v15 = vld [vmem:[%s2262_s7 + $0x1e8] sm:$0xff]  ;;  %v290_v16 = vld [vmem:[%s2262_s7 + $0x1f0] sm:$0xff] }
  0x26   : > { %1964 = vmatmul.mubr.msk.f32.gmra.mrb[10].mxu0 %vm303_vm0, %v239_v17  ;;  %v291_v17 = vld [vmem:[%s2262_s7 + $0x1f8] sm:$0xff] }
  0x27   : > { %1966 = vmatprep.mubr.msk.f32.mxu0 %vm303_vm0, %v240_v20 }
  0x2a   : > { %1967 = vmatmul.mubr.msk.f32.gmra.mrb[12].mxu0 %vm303_vm0, %v241_v27 }
  0x2b   : > { %1969 = vmatprep.mubr.msk.f32.mxu0 %vm303_vm0, %v242_v28 }
  0x2e   : > { %1970 = vmatmul.mubr.msk.f32.gmra.mrb[14].mxu0 %vm303_vm0, %v243_v30 }
  0x2f   : > { %1972 = vmatprep.mubr.msk.f32.mxu0 %vm303_vm0, %v244_v31 }
  0x32   : > { %1973 = vmatmul.mubr.msk.f32.gmra.mrb[16].mxu0 %vm303_vm0, %v245_v32 }
  0x33   : > { %1975 = vmatprep.mubr.msk.f32.mxu0 %vm303_vm0, %v246_v33 }
  0x36   : > { %1976 = vmatmul.mubr.msk.f32.gmra.mrb[18].mxu0 %vm303_vm0, %v247_v34 }
  0x37   : > { %1978 = vmatprep.mubr.msk.f32.mxu0 %vm303_vm0, %v248_v35 }
  0x3a   : > { %1979 = vmatmul.mubr.msk.f32.gmra.mrb[20].mxu0 %vm303_vm0, %v249_v36 }
  0x3b   : > { %1981 = vmatprep.mubr.msk.f32.mxu0 %vm303_vm0, %v250_v37 }
  0x3e   : > { %1982 = vmatmul.mubr.msk.f32.gmra.mrb[22].mxu0 %vm303_vm0, %v251_v38 }
  0x3f   : > { %1984 = vmatprep.mubr.msk.f32.mxu0 %vm303_vm0, %v252_v39 }
  0x42   : > { %1985 = vmatmul.mubr.msk.f32.gmra.mrb[24].mxu0 %vm303_vm0, %v253_v40 }
  0x43   : > { %1987 = vmatprep.mubr.msk.f32.mxu0 %vm303_vm0, %v254_v41 }
  0x46   : > { %1988 = vmatmul.mubr.msk.f32.gmra.mrb[26].mxu0 %vm303_vm0, %v255_v42 }
  0x47   : > { %1990 = vmatprep.mubr.msk.f32.mxu0 %vm303_vm0, %v256_v43 }
  0x4a   : > { %1991 = vmatmul.mubr.msk.f32.gmra.mrb[28].mxu0 %vm303_vm0, %v257_v44 }
  0x4b   : > { %1993 = vmatprep.mubr.msk.f32.mxu0 %vm303_vm0, %v258_v45 }
  0x4e   : > { %1994 = vmatmul.mubr.msk.f32.gmra.mrb[30].mxu0 %vm303_vm0, %v259_v46 }
  0x4f   : > { %1996 = vmatprep.mubr.msk.f32.mxu0 %vm303_vm0, %v260_v47 }
  0x52   : > { %1997 = vmatmul.mubr.msk.f32.gmra.mrb[32].mxu0 %vm303_vm0, %v261_v48 }
  0x53   : > { %1999 = vmatprep.mubr.msk.f32.mxu0 %vm303_vm0, %v262_v49 }
  0x56   : > { %2000 = vmatmul.mubr.msk.f32.gmra.mrb[34].mxu0 %vm303_vm0, %v263_v50 }
  0x57   : > { %2002 = vmatprep.mubr.msk.f32.mxu0 %vm303_vm0, %v264_v51 }
  0x5a   : > { %2003 = vmatmul.mubr.msk.f32.gmra.mrb[36].mxu0 %vm303_vm0, %v265_v52 }
  0x5b   : > { %2005 = vmatprep.mubr.msk.f32.mxu0 %vm303_vm0, %v266_v53 }
  0x5e   : > { %2006 = vmatmul.mubr.msk.f32.gmra.mrb[38].mxu0 %vm303_vm0, %v267_v54 }
  0x5f   : > { %2008 = vmatprep.mubr.msk.f32.mxu0 %vm303_vm0, %v268_v55 }
  0x62   : > { %2009 = vmatmul.mubr.msk.f32.gmra.mrb[40].mxu0 %vm303_vm0, %v269_v56 }
  0x63   : > { %2011 = vmatprep.mubr.msk.f32.mxu0 %vm303_vm0, %v270_v57 }
  0x66   : > { %2012 = vmatmul.mubr.msk.f32.gmra.mrb[42].mxu0 %vm303_vm0, %v271_v58 }
  0x67   : > { %2014 = vmatprep.mubr.msk.f32.mxu0 %vm303_vm0, %v272_v59 }
  0x6a   : > { %2015 = vmatmul.mubr.msk.f32.gmra.mrb[44].mxu0 %vm303_vm0, %v273_v63 }
  0x6b   : > { %2017 = vmatprep.mubr.msk.f32.mxu0 %vm303_vm0, %v274_v0 }
  0x6e   : > { %2018 = vmatmul.mubr.msk.f32.gmra.mrb[46].mxu0 %vm303_vm0, %v275_v1 }
  0x6f   : > { %2020 = vmatprep.mubr.msk.f32.mxu0 %vm303_vm0, %v276_v2 }
  0x72   : > { %2021 = vmatmul.mubr.msk.f32.gmra.mrb[48].mxu0 %vm303_vm0, %v277_v3 }
  0x73   : > { %2023 = vmatprep.mubr.msk.f32.mxu0 %vm303_vm0, %v278_v4 }
  0x76   : > { %2024 = vmatmul.mubr.msk.f32.gmra.mrb[50].mxu0 %vm303_vm0, %v279_v5 }
  0x77   : > { %2026 = vmatprep.mubr.msk.f32.mxu0 %vm303_vm0, %v280_v6 }
  0x7a   : > { %2027 = vmatmul.mubr.msk.f32.gmra.mrb[52].mxu0 %vm303_vm0, %v281_v7 }
  0x7b   : > { %2029 = vmatprep.mubr.msk.f32.mxu0 %vm303_vm0, %v282_v8 }
  0x7e   : > { %2030 = vmatmul.mubr.msk.f32.gmra.mrb[54].mxu0 %vm303_vm0, %v283_v9 }
  0x7f   : > { %2032 = vmatprep.mubr.msk.f32.mxu0 %vm303_vm0, %v284_v10 }
  0x82   : > { %2033 = vmatmul.mubr.msk.f32.gmra.mrb[56].mxu0 %vm303_vm0, %v285_v11 }
  0x83   : > { %2035 = vmatprep.mubr.msk.f32.mxu0 %vm303_vm0, %v286_v12 }
  0x86   : > { %2036 = vmatmul.mubr.msk.f32.gmra.mrb[58].mxu0 %vm303_vm0, %v287_v13 }
  0x87   : > { %2038 = vmatprep.mubr.msk.f32.mxu0 %vm303_vm0, %v288_v14 }
  0x8a   : > { %2039 = vmatmul.mubr.msk.f32.gmra.mrb[60].mxu0 %vm303_vm0, %v289_v15 }
  0x8b   : > { %2041 = vmatprep.mubr.msk.f32.mxu0 %vm303_vm0, %v290_v16 }
  0x8e   : > { %2042 = vmatmul.mubr.msk.f32.gmra.mrb[62].mxu0 %vm303_vm0, %v291_v17 }
  0xe5   : > { %v1950_v19 = vpop.f32.mrb[0].mxu0 }
  0xe6   : > { %v568_v20 = vadd.f32 %v1950_v19, %v2419_v18  ;;  %v562_v21 = vpop.f32.mrb[1].mxu0 }
  0xe7   : > { %v563_v22 = vadd.f32 %v2419_v18, %v562_v21 }
  0xe8   : > { %v882_v25 = vmax.f32 %v568_v20, 0.0 }
  0xe9   : > { %v881_v23 = vmax.f32 %v563_v22, 0.0  ;;  %v1953_v24 = vpop.f32.mrb[2].mxu0 }
  0xea   : > { %v578_v26 = vadd.f32 %v1953_v24, %v2419_v18  ;;  %v572_v27 = vpop.f32.mrb[3].mxu0 }
  0xeb   : > { %v573_v28 = vadd.f32 %v2419_v18, %v572_v27  ;;  %2060 = vmatprep.mubr.msk.f32.mxu0 %vm960_vm1, %v881_v23 }
  0xec   : > { %2061 = vmatmul.mubr.msk.f32.vlgmr.msra.gmra.mrb[64].mxu0 %vm960_vm1, %v882_v25  ;;  %v884_v31 = vmax.f32 %v578_v26, 0.0 }
  0xed   : > { %v883_v29 = vmax.f32 %v573_v28, 0.0  ;;  %v1956_v30 = vpop.f32.mrb[4].mxu0 }
  0xee   : > { %v588_v32 = vadd.f32 %v1956_v30, %v2419_v18  ;;  %v582_v33 = vpop.f32.mrb[5].mxu0 }
  0xef   : > { %v583_v34 = vadd.f32 %v2419_v18, %v582_v33  ;;  %2063 = vmatprep.mubr.msk.f32.mxu1 %vm960_vm1, %v883_v29 }
  0xf0   : > { %2064 = vmatmul.mubr.msk.f32.vlgmr.msra.gmra.mrb[0].mxu1 %vm960_vm1, %v884_v31  ;;  %v886_v37 = vmax.f32 %v588_v32, 0.0 }
  0xf1   : > { %v885_v35 = vmax.f32 %v583_v34, 0.0  ;;  %v1959_v36 = vpop.f32.mrb[6].mxu0 }
  0xf2   : > { %v598_v38 = vadd.f32 %v1959_v36, %v2419_v18  ;;  %v592_v39 = vpop.f32.mrb[7].mxu0 }
  0xf3   : > { %v593_v40 = vadd.f32 %v2419_v18, %v592_v39  ;;  %2066 = vmatprep.mubr.msk.f32.mxu1 %vm960_vm1, %v885_v35 }
  0xf4   : > { %2067 = vmatmul.mubr.msk.f32.gmra.mrb[2].mxu1 %vm960_vm1, %v886_v37  ;;  %v888_v43 = vmax.f32 %v598_v38, 0.0 }
  0xf5   : > { %v887_v41 = vmax.f32 %v593_v40, 0.0  ;;  %v1962_v42 = vpop.f32.mrb[8].mxu0 }
  0xf6   : > { %v608_v44 = vadd.f32 %v1962_v42, %v2419_v18  ;;  %v602_v45 = vpop.f32.mrb[9].mxu0 }
  0xf7   : > { %v603_v46 = vadd.f32 %v2419_v18, %v602_v45  ;;  %2069 = vmatprep.mubr.msk.f32.mxu1 %vm960_vm1, %v887_v41 }
  0xf8   : > { %2070 = vmatmul.mubr.msk.f32.gmra.mrb[4].mxu1 %vm960_vm1, %v888_v43  ;;  %v890_v49 = vmax.f32 %v608_v44, 0.0 }
  0xf9   : > { %v889_v47 = vmax.f32 %v603_v46, 0.0  ;;  %v1965_v48 = vpop.f32.mrb[10].mxu0 }
  0xfa   : > { %v618_v50 = vadd.f32 %v1965_v48, %v2419_v18  ;;  %v612_v51 = vpop.f32.mrb[11].mxu0 }
  0xfb   : > { %v613_v52 = vadd.f32 %v2419_v18, %v612_v51  ;;  %2072 = vmatprep.mubr.msk.f32.mxu1 %vm960_vm1, %v889_v47 }
  0xfc   : > { %2073 = vmatmul.mubr.msk.f32.gmra.mrb[6].mxu1 %vm960_vm1, %v890_v49  ;;  %v892_v55 = vmax.f32 %v618_v50, 0.0 }
  0xfd   : > { %v891_v53 = vmax.f32 %v613_v52, 0.0  ;;  %v1968_v54 = vpop.f32.mrb[12].mxu0 }
  0xfe   : > { %v628_v56 = vadd.f32 %v1968_v54, %v2419_v18  ;;  %v622_v57 = vpop.f32.mrb[13].mxu0 }
  0xff   : > { %v623_v58 = vadd.f32 %v2419_v18, %v622_v57  ;;  %2075 = vmatprep.mubr.msk.f32.mxu1 %vm960_vm1, %v891_v53 }
 0x100   : > { %2076 = vmatmul.mubr.msk.f32.gmra.mrb[8].mxu1 %vm960_vm1, %v892_v55  ;;  %v894_v61 = vmax.f32 %v628_v56, 0.0 }
 0x101   : > { %v893_v59 = vmax.f32 %v623_v58, 0.0  ;;  %v1971_v60 = vpop.f32.mrb[14].mxu0 }
 0x102   : > { %v638_v62 = vadd.f32 %v1971_v60, %v2419_v18  ;;  %v632_v63 = vpop.f32.mrb[15].mxu0 }
 0x103   : > { %v633_v0 = vadd.f32 %v2419_v18, %v632_v63  ;;  %2078 = vmatprep.mubr.msk.f32.mxu1 %vm960_vm1, %v893_v59 }
 0x104   : > { %2079 = vmatmul.mubr.msk.f32.gmra.mrb[10].mxu1 %vm960_vm1, %v894_v61  ;;  %v896_v3 = vmax.f32 %v638_v62, 0.0 }
 0x105   : > { %v895_v1 = vmax.f32 %v633_v0, 0.0  ;;  %v1974_v2 = vpop.f32.mrb[16].mxu0 }
 0x106   : > { %v648_v4 = vadd.f32 %v1974_v2, %v2419_v18  ;;  %v642_v5 = vpop.f32.mrb[17].mxu0 }
 0x107   : > { %v643_v6 = vadd.f32 %v2419_v18, %v642_v5  ;;  %2081 = vmatprep.mubr.msk.f32.mxu1 %vm960_vm1, %v895_v1 }
 0x108   : > { %2082 = vmatmul.mubr.msk.f32.gmra.mrb[12].mxu1 %vm960_vm1, %v896_v3  ;;  %v898_v9 = vmax.f32 %v648_v4, 0.0 }
 0x109   : > { %v897_v7 = vmax.f32 %v643_v6, 0.0  ;;  %v1977_v8 = vpop.f32.mrb[18].mxu0 }
 0x10a   : > { %v658_v10 = vadd.f32 %v1977_v8, %v2419_v18  ;;  %v652_v11 = vpop.f32.mrb[19].mxu0 }
 0x10b   : > { %v653_v12 = vadd.f32 %v2419_v18, %v652_v11  ;;  %2084 = vmatprep.mubr.msk.f32.mxu1 %vm960_vm1, %v897_v7 }
 0x10c   : > { %2085 = vmatmul.mubr.msk.f32.gmra.mrb[14].mxu1 %vm960_vm1, %v898_v9  ;;  %v900_v15 = vmax.f32 %v658_v10, 0.0 }
 0x10d   : > { %v899_v13 = vmax.f32 %v653_v12, 0.0  ;;  %v1980_v14 = vpop.f32.mrb[20].mxu0 }
 0x10e   : > { %v668_v16 = vadd.f32 %v1980_v14, %v2419_v18  ;;  %v662_v17 = vpop.f32.mrb[21].mxu0 }
 0x10f   : > { %v663_v19 = vadd.f32 %v2419_v18, %v662_v17  ;;  %2087 = vmatprep.mubr.msk.f32.mxu1 %vm960_vm1, %v899_v13 }
 0x110   : > { %2088 = vmatmul.mubr.msk.f32.gmra.mrb[16].mxu1 %vm960_vm1, %v900_v15  ;;  %v902_v22 = vmax.f32 %v668_v16, 0.0 }
 0x111   : > { %v901_v20 = vmax.f32 %v663_v19, 0.0  ;;  %v1983_v21 = vpop.f32.mrb[22].mxu0 }
 0x112   : > { %v678_v23 = vadd.f32 %v1983_v21, %v2419_v18  ;;  %v672_v24 = vpop.f32.mrb[23].mxu0 }
 0x113   : > { %v673_v25 = vadd.f32 %v2419_v18, %v672_v24  ;;  %2090 = vmatprep.mubr.msk.f32.mxu1 %vm960_vm1, %v901_v20 }
 0x114   : > { %2091 = vmatmul.mubr.msk.f32.gmra.mrb[18].mxu1 %vm960_vm1, %v902_v22  ;;  %v904_v28 = vmax.f32 %v678_v23, 0.0 }
 0x115   : > { %v903_v26 = vmax.f32 %v673_v25, 0.0  ;;  %v1986_v27 = vpop.f32.mrb[24].mxu0 }
 0x116   : > { %v688_v29 = vadd.f32 %v1986_v27, %v2419_v18  ;;  %v682_v30 = vpop.f32.mrb[25].mxu0 }
 0x117   : > { %v683_v31 = vadd.f32 %v2419_v18, %v682_v30  ;;  %2093 = vmatprep.mubr.msk.f32.mxu1 %vm960_vm1, %v903_v26 }
 0x118   : > { %2094 = vmatmul.mubr.msk.f32.gmra.mrb[20].mxu1 %vm960_vm1, %v904_v28  ;;  %v906_v34 = vmax.f32 %v688_v29, 0.0 }
 0x119   : > { %v905_v32 = vmax.f32 %v683_v31, 0.0  ;;  %v1989_v33 = vpop.f32.mrb[26].mxu0 }
 0x11a   : > { %v698_v35 = vadd.f32 %v1989_v33, %v2419_v18  ;;  %v692_v36 = vpop.f32.mrb[27].mxu0 }
 0x11b   : > { %v693_v37 = vadd.f32 %v2419_v18, %v692_v36  ;;  %2096 = vmatprep.mubr.msk.f32.mxu1 %vm960_vm1, %v905_v32 }
 0x11c   : > { %2097 = vmatmul.mubr.msk.f32.gmra.mrb[22].mxu1 %vm960_vm1, %v906_v34  ;;  %v908_v40 = vmax.f32 %v698_v35, 0.0 }
 0x11d   : > { %v907_v38 = vmax.f32 %v693_v37, 0.0  ;;  %v1992_v39 = vpop.f32.mrb[28].mxu0 }
 0x11e   : > { %v708_v41 = vadd.f32 %v1992_v39, %v2419_v18  ;;  %v702_v42 = vpop.f32.mrb[29].mxu0 }
 0x11f   : > { %v703_v43 = vadd.f32 %v2419_v18, %v702_v42  ;;  %2099 = vmatprep.mubr.msk.f32.mxu1 %vm960_vm1, %v907_v38 }
 0x120   : > { %2100 = vmatmul.mubr.msk.f32.gmra.mrb[24].mxu1 %vm960_vm1, %v908_v40  ;;  %v910_v46 = vmax.f32 %v708_v41, 0.0 }
 0x121   : > { %v909_v44 = vmax.f32 %v703_v43, 0.0  ;;  %v1995_v45 = vpop.f32.mrb[30].mxu0 }
 0x122   : > { %v718_v47 = vadd.f32 %v1995_v45, %v2419_v18  ;;  %v712_v48 = vpop.f32.mrb[31].mxu0 }
 0x123   : > { %v713_v49 = vadd.f32 %v2419_v18, %v712_v48  ;;  %2102 = vmatprep.mubr.msk.f32.mxu1 %vm960_vm1, %v909_v44 }
 0x124   : > { %2103 = vmatmul.mubr.msk.f32.gmra.mrb[26].mxu1 %vm960_vm1, %v910_v46  ;;  %v912_v52 = vmax.f32 %v718_v47, 0.0 }
 0x125   : > { %v911_v50 = vmax.f32 %v713_v49, 0.0  ;;  %v1998_v51 = vpop.f32.mrb[32].mxu0 }
 0x126   : > { %v728_v53 = vadd.f32 %v1998_v51, %v2419_v18  ;;  %v722_v54 = vpop.f32.mrb[33].mxu0 }
 0x127   : > { %v723_v55 = vadd.f32 %v2419_v18, %v722_v54  ;;  %2105 = vmatprep.mubr.msk.f32.mxu1 %vm960_vm1, %v911_v50 }
 0x128   : > { %2106 = vmatmul.mubr.msk.f32.gmra.mrb[28].mxu1 %vm960_vm1, %v912_v52  ;;  %v914_v58 = vmax.f32 %v728_v53, 0.0 }
 0x129   : > { %v913_v56 = vmax.f32 %v723_v55, 0.0  ;;  %v2001_v57 = vpop.f32.mrb[34].mxu0 }
 0x12a   : > { %v738_v59 = vadd.f32 %v2001_v57, %v2419_v18  ;;  %v732_v60 = vpop.f32.mrb[35].mxu0 }
 0x12b   : > { %v733_v61 = vadd.f32 %v2419_v18, %v732_v60  ;;  %2108 = vmatprep.mubr.msk.f32.mxu1 %vm960_vm1, %v913_v56 }
 0x12c   : > { %2109 = vmatmul.mubr.msk.f32.gmra.mrb[30].mxu1 %vm960_vm1, %v914_v58  ;;  %v916_v0 = vmax.f32 %v738_v59, 0.0 }
 0x12d   : > { %v915_v62 = vmax.f32 %v733_v61, 0.0  ;;  %v2004_v63 = vpop.f32.mrb[36].mxu0 }
 0x12e   : > { %v748_v1 = vadd.f32 %v2004_v63, %v2419_v18  ;;  %v742_v2 = vpop.f32.mrb[37].mxu0 }
 0x12f   : > { %v743_v3 = vadd.f32 %v2419_v18, %v742_v2  ;;  %2111 = vmatprep.mubr.msk.f32.mxu1 %vm960_vm1, %v915_v62 }
 0x130   : > { %2112 = vmatmul.mubr.msk.f32.gmra.mrb[32].mxu1 %vm960_vm1, %v916_v0  ;;  %v918_v6 = vmax.f32 %v748_v1, 0.0 }
 0x131   : > { %v917_v4 = vmax.f32 %v743_v3, 0.0  ;;  %v2007_v5 = vpop.f32.mrb[38].mxu0 }
 0x132   : > { %v758_v7 = vadd.f32 %v2007_v5, %v2419_v18  ;;  %v752_v8 = vpop.f32.mrb[39].mxu0 }
 0x133   : > { %v753_v9 = vadd.f32 %v2419_v18, %v752_v8  ;;  %2114 = vmatprep.mubr.msk.f32.mxu1 %vm960_vm1, %v917_v4 }
 0x134   : > { %2115 = vmatmul.mubr.msk.f32.gmra.mrb[34].mxu1 %vm960_vm1, %v918_v6  ;;  %v920_v12 = vmax.f32 %v758_v7, 0.0 }
 0x135   : > { %v919_v10 = vmax.f32 %v753_v9, 0.0  ;;  %v2010_v11 = vpop.f32.mrb[40].mxu0 }
 0x136   : > { %v768_v13 = vadd.f32 %v2010_v11, %v2419_v18  ;;  %v762_v14 = vpop.f32.mrb[41].mxu0 }
 0x137   : > { %v763_v15 = vadd.f32 %v2419_v18, %v762_v14  ;;  %2117 = vmatprep.mubr.msk.f32.mxu1 %vm960_vm1, %v919_v10 }
 0x138   : > { %2118 = vmatmul.mubr.msk.f32.gmra.mrb[36].mxu1 %vm960_vm1, %v920_v12  ;;  %v922_v19 = vmax.f32 %v768_v13, 0.0 }
 0x139   : > { %v921_v16 = vmax.f32 %v763_v15, 0.0  ;;  %v2013_v17 = vpop.f32.mrb[42].mxu0 }
 0x13a   : > { %v778_v20 = vadd.f32 %v2013_v17, %v2419_v18  ;;  %v772_v21 = vpop.f32.mrb[43].mxu0 }
 0x13b   : > { %v773_v22 = vadd.f32 %v2419_v18, %v772_v21  ;;  %2120 = vmatprep.mubr.msk.f32.mxu1 %vm960_vm1, %v921_v16 }
 0x13c   : > { %2121 = vmatmul.mubr.msk.f32.gmra.mrb[38].mxu1 %vm960_vm1, %v922_v19  ;;  %v924_v25 = vmax.f32 %v778_v20, 0.0 }
 0x13d   : > { %v923_v23 = vmax.f32 %v773_v22, 0.0  ;;  %v2016_v24 = vpop.f32.mrb[44].mxu0  ;;  %v2552_v22 = vld [vmem:[%s2760_s4] ss:$0 sm:$0xff] }
 0x13e   : > { %v788_v26 = vadd.f32 %v2016_v24, %v2419_v18  ;;  %v782_v27 = vpop.f32.mrb[45].mxu0 }
 0x13f   : > { %v783_v28 = vadd.f32 %v2419_v18, %v782_v27  ;;  %2123 = vmatprep.mubr.msk.f32.mxu1 %vm960_vm1, %v923_v23 }
 0x140   : > { %2124 = vmatmul.mubr.msk.f32.gmra.mrb[40].mxu1 %vm960_vm1, %v924_v25  ;;  %v926_v31 = vmax.f32 %v788_v26, 0.0 }
 0x141   : > { %v925_v29 = vmax.f32 %v783_v28, 0.0  ;;  %v2019_v30 = vpop.f32.mrb[46].mxu0 }
 0x142   : > { %v798_v32 = vadd.f32 %v2019_v30, %v2419_v18  ;;  %v792_v33 = vpop.f32.mrb[47].mxu0 }
 0x143   : > { %v793_v34 = vadd.f32 %v2419_v18, %v792_v33  ;;  %2126 = vmatprep.mubr.msk.f32.mxu1 %vm960_vm1, %v925_v29 }
 0x144   : > { %2127 = vmatmul.mubr.msk.f32.gmra.mrb[42].mxu1 %vm960_vm1, %v926_v31  ;;  %v928_v37 = vmax.f32 %v798_v32, 0.0 }
 0x145   : > { %v927_v35 = vmax.f32 %v793_v34, 0.0  ;;  %v2022_v36 = vpop.f32.mrb[48].mxu0 }
 0x146   : > { %v808_v38 = vadd.f32 %v2022_v36, %v2419_v18  ;;  %v802_v39 = vpop.f32.mrb[49].mxu0 }
 0x147   : > { %v803_v40 = vadd.f32 %v2419_v18, %v802_v39  ;;  %2129 = vmatprep.mubr.msk.f32.mxu1 %vm960_vm1, %v927_v35 }
 0x148   : > { %2130 = vmatmul.mubr.msk.f32.gmra.mrb[44].mxu1 %vm960_vm1, %v928_v37  ;;  %v930_v43 = vmax.f32 %v808_v38, 0.0 }
 0x149   : > { %v929_v41 = vmax.f32 %v803_v40, 0.0  ;;  %v2025_v42 = vpop.f32.mrb[50].mxu0 }
 0x14a   : > { %v818_v44 = vadd.f32 %v2025_v42, %v2419_v18  ;;  %v812_v45 = vpop.f32.mrb[51].mxu0 }
 0x14b   : > { %v813_v46 = vadd.f32 %v2419_v18, %v812_v45  ;;  %2132 = vmatprep.mubr.msk.f32.mxu1 %vm960_vm1, %v929_v41 }
 0x14c   : > { %2133 = vmatmul.mubr.msk.f32.gmra.mrb[46].mxu1 %vm960_vm1, %v930_v43  ;;  %v932_v49 = vmax.f32 %v818_v44, 0.0 }
 0x14d   : > { %v931_v47 = vmax.f32 %v813_v46, 0.0  ;;  %v2028_v48 = vpop.f32.mrb[52].mxu0 }
 0x14e   : > { %v828_v50 = vadd.f32 %v2028_v48, %v2419_v18  ;;  %v822_v51 = vpop.f32.mrb[53].mxu0 }
 0x14f   : > { %v823_v52 = vadd.f32 %v2419_v18, %v822_v51  ;;  %2135 = vmatprep.mubr.msk.f32.mxu1 %vm960_vm1, %v931_v47 }
 0x150   : > { %2136 = vmatmul.mubr.msk.f32.gmra.mrb[48].mxu1 %vm960_vm1, %v932_v49  ;;  %v934_v55 = vmax.f32 %v828_v50, 0.0 }
 0x151   : > { %v933_v53 = vmax.f32 %v823_v52, 0.0  ;;  %v2031_v54 = vpop.f32.mrb[54].mxu0 }
 0x152   : > { %v838_v56 = vadd.f32 %v2031_v54, %v2419_v18  ;;  %v832_v57 = vpop.f32.mrb[55].mxu0 }
 0x153   : > { %v833_v58 = vadd.f32 %v2419_v18, %v832_v57  ;;  %2138 = vmatprep.mubr.msk.f32.mxu1 %vm960_vm1, %v933_v53 }
 0x154   : > { %2139 = vmatmul.mubr.msk.f32.gmra.mrb[50].mxu1 %vm960_vm1, %v934_v55  ;;  %v936_v61 = vmax.f32 %v838_v56, 0.0 }
 0x155   : > { %v935_v59 = vmax.f32 %v833_v58, 0.0  ;;  %v2034_v60 = vpop.f32.mrb[56].mxu0 }
 0x156   : > { %v848_v62 = vadd.f32 %v2034_v60, %v2419_v18  ;;  %v842_v63 = vpop.f32.mrb[57].mxu0 }
 0x157   : > { %v843_v0 = vadd.f32 %v2419_v18, %v842_v63  ;;  %2141 = vmatprep.mubr.msk.f32.mxu1 %vm960_vm1, %v935_v59 }
 0x158   : > { %2142 = vmatmul.mubr.msk.f32.gmra.mrb[52].mxu1 %vm960_vm1, %v936_v61  ;;  %v938_v3 = vmax.f32 %v848_v62, 0.0 }
 0x159   : > { %v937_v1 = vmax.f32 %v843_v0, 0.0  ;;  %v2037_v2 = vpop.f32.mrb[58].mxu0 }
 0x15a   : > { %v858_v4 = vadd.f32 %v2037_v2, %v2419_v18  ;;  %v852_v5 = vpop.f32.mrb[59].mxu0 }
 0x15b   : > { %v853_v6 = vadd.f32 %v2419_v18, %v852_v5  ;;  %2144 = vmatprep.mubr.msk.f32.mxu1 %vm960_vm1, %v937_v1 }
 0x15c   : > { %2145 = vmatmul.mubr.msk.f32.gmra.mrb[54].mxu1 %vm960_vm1, %v938_v3  ;;  %v940_v9 = vmax.f32 %v858_v4, 0.0 }
 0x15d   : > { %v939_v7 = vmax.f32 %v853_v6, 0.0  ;;  %v2040_v8 = vpop.f32.mrb[60].mxu0 }
 0x15e   : > { %v868_v10 = vadd.f32 %v2040_v8, %v2419_v18  ;;  %v862_v11 = vpop.f32.mrb[61].mxu0 }
 0x15f   : > { %v863_v12 = vadd.f32 %v2419_v18, %v862_v11  ;;  %2147 = vmatprep.mubr.msk.f32.mxu1 %vm960_vm1, %v939_v7 }
 0x160   : > { %2148 = vmatmul.mubr.msk.f32.gmra.mrb[56].mxu1 %vm960_vm1, %v940_v9  ;;  %v942_v15 = vmax.f32 %v868_v10, 0.0 }
 0x161   : > { %v941_v13 = vmax.f32 %v863_v12, 0.0  ;;  %v2043_v14 = vpop.f32.mrb[62].mxu0 }
 0x162   : > { %v878_v16 = vadd.f32 %v2043_v14, %v2419_v18  ;;  %v872_v17 = vpop.f32.mrb[63].mxu0 }
 0x163   : > { %v873_v19 = vadd.f32 %v2419_v18, %v872_v17  ;;  %2150 = vmatprep.mubr.msk.f32.mxu1 %vm960_vm1, %v941_v13 }
 0x164   : > { %2151 = vmatmul.mubr.msk.f32.gmra.mrb[58].mxu1 %vm960_vm1, %v942_v15  ;;  %v944_v21 = vmax.f32 %v878_v16, 0.0 }
 0x165   : > { %v943_v20 = vmax.f32 %v873_v19, 0.0 }
 0x167   : > { %2153 = vmatprep.mubr.msk.f32.mxu1 %vm960_vm1, %v943_v20 }
 0x168   : > { %2154 = vmatmul.mubr.msk.f32.gmra.mrb[60].mxu1 %vm960_vm1, %v944_v21 }
 0x1bf   : > { %v2062_v18 = vpop.f32.mrb[64].mxu0 }
 0x1c0   : > { %v1225_v23 = vadd.f32 %v2062_v18, %v2552_v22  ;;  %v1219_v24 = vpop.f32.mrb[65].mxu0 }
 0x1c1   : > { %v1220_v25 = vadd.f32 %v2552_v22, %v1219_v24 }
 0x1c2   : > { %1540 = vst.msk [vmem:[%s2559_s8 + $0x8] sm:$0xff] %vm1538_vm2, %v1225_v23 }
 0x1c3   : > { %1539 = vst.msk [vmem:[%s2559_s8] sm:$0xff] %vm1538_vm2, %v1220_v25  ;;  %v2065_v26 = vpop.f32.mrb[0].mxu1 }
 0x1c4   : > { %v1235_v27 = vadd.f32 %v2065_v26, %v2552_v22  ;;  %v1229_v28 = vpop.f32.mrb[1].mxu1 }
 0x1c5   : > { %v1230_v29 = vadd.f32 %v2552_v22, %v1229_v28 }
 0x1c6   : > { %1542 = vst.msk [vmem:[%s2559_s8 + $0x18] sm:$0xff] %vm1538_vm2, %v1235_v27 }
 0x1c7   : > { %1541 = vst.msk [vmem:[%s2559_s8 + $0x10] sm:$0xff] %vm1538_vm2, %v1230_v29  ;;  %v2068_v30 = vpop.f32.mrb[2].mxu1 }
 0x1c8   : > { %v1245_v31 = vadd.f32 %v2068_v30, %v2552_v22  ;;  %v1239_v32 = vpop.f32.mrb[3].mxu1 }
 0x1c9   : > { %v1240_v33 = vadd.f32 %v2552_v22, %v1239_v32 }
 0x1ca   : > { %1544 = vst.msk [vmem:[%s2559_s8 + $0x28] sm:$0xff] %vm1538_vm2, %v1245_v31 }
 0x1cb   : > { %1543 = vst.msk [vmem:[%s2559_s8 + $0x20] sm:$0xff] %vm1538_vm2, %v1240_v33  ;;  %v2071_v34 = vpop.f32.mrb[4].mxu1 }
 0x1cc   : > { %v1255_v35 = vadd.f32 %v2071_v34, %v2552_v22  ;;  %v1249_v36 = vpop.f32.mrb[5].mxu1 }
 0x1cd   : > { %v1250_v37 = vadd.f32 %v2552_v22, %v1249_v36 }
 0x1ce   : > { %1546 = vst.msk [vmem:[%s2559_s8 + $0x38] sm:$0xff] %vm1538_vm2, %v1255_v35 }
 0x1cf   : > { %1545 = vst.msk [vmem:[%s2559_s8 + $0x30] sm:$0xff] %vm1538_vm2, %v1250_v37  ;;  %v2074_v38 = vpop.f32.mrb[6].mxu1 }
 0x1d0   : > { %v1265_v39 = vadd.f32 %v2074_v38, %v2552_v22  ;;  %v1259_v40 = vpop.f32.mrb[7].mxu1 }
 0x1d1   : > { %v1260_v41 = vadd.f32 %v2552_v22, %v1259_v40 }
 0x1d2   : > { %1548 = vst.msk [vmem:[%s2559_s8 + $0x48] sm:$0xff] %vm1538_vm2, %v1265_v39 }
 0x1d3   : > { %1547 = vst.msk [vmem:[%s2559_s8 + $0x40] sm:$0xff] %vm1538_vm2, %v1260_v41  ;;  %v2077_v42 = vpop.f32.mrb[8].mxu1 }
 0x1d4   : > { %v1275_v43 = vadd.f32 %v2077_v42, %v2552_v22  ;;  %v1269_v44 = vpop.f32.mrb[9].mxu1 }
 0x1d5   : > { %v1270_v45 = vadd.f32 %v2552_v22, %v1269_v44 }
 0x1d6   : > { %1550 = vst.msk [vmem:[%s2559_s8 + $0x58] sm:$0xff] %vm1538_vm2, %v1275_v43 }
 0x1d7   : > { %1549 = vst.msk [vmem:[%s2559_s8 + $0x50] sm:$0xff] %vm1538_vm2, %v1270_v45  ;;  %v2080_v46 = vpop.f32.mrb[10].mxu1 }
 0x1d8   : > { %v1285_v47 = vadd.f32 %v2080_v46, %v2552_v22  ;;  %v1279_v48 = vpop.f32.mrb[11].mxu1 }
 0x1d9   : > { %v1280_v49 = vadd.f32 %v2552_v22, %v1279_v48 }
 0x1da   : > { %1552 = vst.msk [vmem:[%s2559_s8 + $0x68] sm:$0xff] %vm1538_vm2, %v1285_v47 }
 0x1db   : > { %1551 = vst.msk [vmem:[%s2559_s8 + $0x60] sm:$0xff] %vm1538_vm2, %v1280_v49  ;;  %v2083_v50 = vpop.f32.mrb[12].mxu1 }
 0x1dc   : > { %v1295_v51 = vadd.f32 %v2083_v50, %v2552_v22  ;;  %v1289_v52 = vpop.f32.mrb[13].mxu1 }
 0x1dd   : > { %v1290_v53 = vadd.f32 %v2552_v22, %v1289_v52 }
 0x1de   : > { %1554 = vst.msk [vmem:[%s2559_s8 + $0x78] sm:$0xff] %vm1538_vm2, %v1295_v51 }
 0x1df   : > { %1553 = vst.msk [vmem:[%s2559_s8 + $0x70] sm:$0xff] %vm1538_vm2, %v1290_v53  ;;  %v2086_v54 = vpop.f32.mrb[14].mxu1 }
 0x1e0   : > { %v1305_v55 = vadd.f32 %v2086_v54, %v2552_v22  ;;  %v1299_v56 = vpop.f32.mrb[15].mxu1 }
 0x1e1   : > { %v1300_v57 = vadd.f32 %v2552_v22, %v1299_v56 }
 0x1e2   : > { %1556 = vst.msk [vmem:[%s2559_s8 + $0x88] sm:$0xff] %vm1538_vm2, %v1305_v55 }
 0x1e3   : > { %1555 = vst.msk [vmem:[%s2559_s8 + $0x80] sm:$0xff] %vm1538_vm2, %v1300_v57  ;;  %v2089_v58 = vpop.f32.mrb[16].mxu1 }
 0x1e4   : > { %v1315_v59 = vadd.f32 %v2089_v58, %v2552_v22  ;;  %v1309_v60 = vpop.f32.mrb[17].mxu1 }
 0x1e5   : > { %v1310_v61 = vadd.f32 %v2552_v22, %v1309_v60 }
 0x1e6   : > { %1558 = vst.msk [vmem:[%s2559_s8 + $0x98] sm:$0xff] %vm1538_vm2, %v1315_v59 }
 0x1e7   : > { %1557 = vst.msk [vmem:[%s2559_s8 + $0x90] sm:$0xff] %vm1538_vm2, %v1310_v61  ;;  %v2092_v62 = vpop.f32.mrb[18].mxu1 }
 0x1e8   : > { %v1325_v63 = vadd.f32 %v2092_v62, %v2552_v22  ;;  %v1319_v0 = vpop.f32.mrb[19].mxu1 }
 0x1e9   : > { %v1320_v1 = vadd.f32 %v2552_v22, %v1319_v0 }
 0x1ea   : > { %1560 = vst.msk [vmem:[%s2559_s8 + $0xa8] sm:$0xff] %vm1538_vm2, %v1325_v63 }
 0x1eb   : > { %1559 = vst.msk [vmem:[%s2559_s8 + $0xa0] sm:$0xff] %vm1538_vm2, %v1320_v1  ;;  %v2095_v2 = vpop.f32.mrb[20].mxu1 }
 0x1ec   : > { %v1335_v3 = vadd.f32 %v2095_v2, %v2552_v22  ;;  %v1329_v4 = vpop.f32.mrb[21].mxu1 }
 0x1ed   : > { %v1330_v5 = vadd.f32 %v2552_v22, %v1329_v4 }
 0x1ee   : > { %1562 = vst.msk [vmem:[%s2559_s8 + $0xb8] sm:$0xff] %vm1538_vm2, %v1335_v3 }
 0x1ef   : > { %1561 = vst.msk [vmem:[%s2559_s8 + $0xb0] sm:$0xff] %vm1538_vm2, %v1330_v5  ;;  %v2098_v6 = vpop.f32.mrb[22].mxu1 }
 0x1f0   : > { %v1345_v7 = vadd.f32 %v2098_v6, %v2552_v22  ;;  %v1339_v8 = vpop.f32.mrb[23].mxu1 }
 0x1f1   : > { %v1340_v9 = vadd.f32 %v2552_v22, %v1339_v8 }
 0x1f2   : > { %1564 = vst.msk [vmem:[%s2559_s8 + $0xc8] sm:$0xff] %vm1538_vm2, %v1345_v7 }
 0x1f3   : > { %1563 = vst.msk [vmem:[%s2559_s8 + $0xc0] sm:$0xff] %vm1538_vm2, %v1340_v9  ;;  %v2101_v10 = vpop.f32.mrb[24].mxu1 }
 0x1f4   : > { %v1355_v11 = vadd.f32 %v2101_v10, %v2552_v22  ;;  %v1349_v12 = vpop.f32.mrb[25].mxu1 }
 0x1f5   : > { %v1350_v13 = vadd.f32 %v2552_v22, %v1349_v12 }
 0x1f6   : > { %1566 = vst.msk [vmem:[%s2559_s8 + $0xd8] sm:$0xff] %vm1538_vm2, %v1355_v11 }
 0x1f7   : > { %1565 = vst.msk [vmem:[%s2559_s8 + $0xd0] sm:$0xff] %vm1538_vm2, %v1350_v13  ;;  %v2104_v14 = vpop.f32.mrb[26].mxu1 }
 0x1f8   : > { %v1365_v15 = vadd.f32 %v2104_v14, %v2552_v22  ;;  %v1359_v16 = vpop.f32.mrb[27].mxu1 }
 0x1f9   : > { %v1360_v17 = vadd.f32 %v2552_v22, %v1359_v16 }
 0x1fa   : > { %1568 = vst.msk [vmem:[%s2559_s8 + $0xe8] sm:$0xff] %vm1538_vm2, %v1365_v15 }
 0x1fb   : > { %1567 = vst.msk [vmem:[%s2559_s8 + $0xe0] sm:$0xff] %vm1538_vm2, %v1360_v17  ;;  %v2107_v19 = vpop.f32.mrb[28].mxu1 }
 0x1fc   : > { %v1375_v20 = vadd.f32 %v2107_v19, %v2552_v22  ;;  %v1369_v21 = vpop.f32.mrb[29].mxu1 }
 0x1fd   : > { %v1370_v18 = vadd.f32 %v2552_v22, %v1369_v21 }
 0x1fe   : > { %1570 = vst.msk [vmem:[%s2559_s8 + $0xf8] sm:$0xff] %vm1538_vm2, %v1375_v20 }
 0x1ff   : > { %1569 = vst.msk [vmem:[%s2559_s8 + $0xf0] sm:$0xff] %vm1538_vm2, %v1370_v18  ;;  %v2110_v23 = vpop.f32.mrb[30].mxu1 }
 0x200   : > { %v1385_v24 = vadd.f32 %v2110_v23, %v2552_v22  ;;  %v1379_v25 = vpop.f32.mrb[31].mxu1 }
 0x201   : > { %v1380_v26 = vadd.f32 %v2552_v22, %v1379_v25 }
 0x202   : > { %1572 = vst.msk [vmem:[%s2559_s8 + $0x108] sm:$0xff] %vm1538_vm2, %v1385_v24 }
 0x203   : > { %1571 = vst.msk [vmem:[%s2559_s8 + $0x100] sm:$0xff] %vm1538_vm2, %v1380_v26  ;;  %v2113_v27 = vpop.f32.mrb[32].mxu1 }
 0x204   : > { %v1395_v28 = vadd.f32 %v2113_v27, %v2552_v22  ;;  %v1389_v29 = vpop.f32.mrb[33].mxu1 }
 0x205   : > { %v1390_v30 = vadd.f32 %v2552_v22, %v1389_v29 }
 0x206   : > { %1574 = vst.msk [vmem:[%s2559_s8 + $0x118] sm:$0xff] %vm1538_vm2, %v1395_v28 }
 0x207   : > { %1573 = vst.msk [vmem:[%s2559_s8 + $0x110] sm:$0xff] %vm1538_vm2, %v1390_v30  ;;  %v2116_v31 = vpop.f32.mrb[34].mxu1 }
 0x208   : > { %v1405_v32 = vadd.f32 %v2116_v31, %v2552_v22  ;;  %v1399_v33 = vpop.f32.mrb[35].mxu1 }
 0x209   : > { %v1400_v34 = vadd.f32 %v2552_v22, %v1399_v33 }
 0x20a   : > { %1576 = vst.msk [vmem:[%s2559_s8 + $0x128] sm:$0xff] %vm1538_vm2, %v1405_v32 }
 0x20b   : > { %1575 = vst.msk [vmem:[%s2559_s8 + $0x120] sm:$0xff] %vm1538_vm2, %v1400_v34  ;;  %v2119_v35 = vpop.f32.mrb[36].mxu1 }
 0x20c   : > { %v1415_v36 = vadd.f32 %v2119_v35, %v2552_v22  ;;  %v1409_v37 = vpop.f32.mrb[37].mxu1 }
 0x20d   : > { %v1410_v38 = vadd.f32 %v2552_v22, %v1409_v37 }
 0x20e   : > { %1578 = vst.msk [vmem:[%s2559_s8 + $0x138] sm:$0xff] %vm1538_vm2, %v1415_v36 }
 0x20f   : > { %1577 = vst.msk [vmem:[%s2559_s8 + $0x130] sm:$0xff] %vm1538_vm2, %v1410_v38  ;;  %v2122_v39 = vpop.f32.mrb[38].mxu1 }
 0x210   : > { %v1425_v40 = vadd.f32 %v2122_v39, %v2552_v22  ;;  %v1419_v41 = vpop.f32.mrb[39].mxu1 }
 0x211   : > { %v1420_v42 = vadd.f32 %v2552_v22, %v1419_v41 }
 0x212   : > { %1580 = vst.msk [vmem:[%s2559_s8 + $0x148] sm:$0xff] %vm1538_vm2, %v1425_v40 }
 0x213   : > { %1579 = vst.msk [vmem:[%s2559_s8 + $0x140] sm:$0xff] %vm1538_vm2, %v1420_v42  ;;  %v2125_v43 = vpop.f32.mrb[40].mxu1 }
 0x214   : > { %v1435_v44 = vadd.f32 %v2125_v43, %v2552_v22  ;;  %v1429_v45 = vpop.f32.mrb[41].mxu1 }
 0x215   : > { %v1430_v46 = vadd.f32 %v2552_v22, %v1429_v45 }
 0x216   : > { %1582 = vst.msk [vmem:[%s2559_s8 + $0x158] sm:$0xff] %vm1538_vm2, %v1435_v44 }
 0x217   : > { %1581 = vst.msk [vmem:[%s2559_s8 + $0x150] sm:$0xff] %vm1538_vm2, %v1430_v46  ;;  %v2128_v47 = vpop.f32.mrb[42].mxu1 }
 0x218   : > { %v1445_v48 = vadd.f32 %v2128_v47, %v2552_v22  ;;  %v1439_v49 = vpop.f32.mrb[43].mxu1 }
 0x219   : > { %v1440_v50 = vadd.f32 %v2552_v22, %v1439_v49 }
 0x21a   : > { %1584 = vst.msk [vmem:[%s2559_s8 + $0x168] sm:$0xff] %vm1538_vm2, %v1445_v48 }
 0x21b   : > { %1583 = vst.msk [vmem:[%s2559_s8 + $0x160] sm:$0xff] %vm1538_vm2, %v1440_v50  ;;  %v2131_v51 = vpop.f32.mrb[44].mxu1 }
 0x21c   : > { %v1455_v52 = vadd.f32 %v2131_v51, %v2552_v22  ;;  %v1449_v53 = vpop.f32.mrb[45].mxu1 }
 0x21d   : > { %v1450_v54 = vadd.f32 %v2552_v22, %v1449_v53 }
 0x21e   : > { %1586 = vst.msk [vmem:[%s2559_s8 + $0x178] sm:$0xff] %vm1538_vm2, %v1455_v52 }
 0x21f   : > { %1585 = vst.msk [vmem:[%s2559_s8 + $0x170] sm:$0xff] %vm1538_vm2, %v1450_v54  ;;  %v2134_v55 = vpop.f32.mrb[46].mxu1 }
 0x220   : > { %v1465_v56 = vadd.f32 %v2134_v55, %v2552_v22  ;;  %v1459_v57 = vpop.f32.mrb[47].mxu1 }
 0x221   : > { %v1460_v58 = vadd.f32 %v2552_v22, %v1459_v57 }
 0x222   : > { %1588 = vst.msk [vmem:[%s2559_s8 + $0x188] sm:$0xff] %vm1538_vm2, %v1465_v56 }
 0x223   : > { %1587 = vst.msk [vmem:[%s2559_s8 + $0x180] sm:$0xff] %vm1538_vm2, %v1460_v58  ;;  %v2137_v59 = vpop.f32.mrb[48].mxu1 }
 0x224   : > { %v1475_v60 = vadd.f32 %v2137_v59, %v2552_v22  ;;  %v1469_v61 = vpop.f32.mrb[49].mxu1 }
 0x225   : > { %v1470_v62 = vadd.f32 %v2552_v22, %v1469_v61 }
 0x226   : > { %1590 = vst.msk [vmem:[%s2559_s8 + $0x198] sm:$0xff] %vm1538_vm2, %v1475_v60 }
 0x227   : > { %1589 = vst.msk [vmem:[%s2559_s8 + $0x190] sm:$0xff] %vm1538_vm2, %v1470_v62  ;;  %v2140_v63 = vpop.f32.mrb[50].mxu1 }
 0x228   : > { %v1485_v0 = vadd.f32 %v2140_v63, %v2552_v22  ;;  %v1479_v1 = vpop.f32.mrb[51].mxu1 }
 0x229   : > { %v1480_v2 = vadd.f32 %v2552_v22, %v1479_v1 }
 0x22a   : > { %1592 = vst.msk [vmem:[%s2559_s8 + $0x1a8] sm:$0xff] %vm1538_vm2, %v1485_v0 }
 0x22b   : > { %1591 = vst.msk [vmem:[%s2559_s8 + $0x1a0] sm:$0xff] %vm1538_vm2, %v1480_v2  ;;  %v2143_v3 = vpop.f32.mrb[52].mxu1 }
 0x22c   : > { %v1495_v4 = vadd.f32 %v2143_v3, %v2552_v22  ;;  %v1489_v5 = vpop.f32.mrb[53].mxu1 }
 0x22d   : > { %v1490_v6 = vadd.f32 %v2552_v22, %v1489_v5 }
 0x22e   : > { %1594 = vst.msk [vmem:[%s2559_s8 + $0x1b8] sm:$0xff] %vm1538_vm2, %v1495_v4 }
 0x22f   : > { %1593 = vst.msk [vmem:[%s2559_s8 + $0x1b0] sm:$0xff] %vm1538_vm2, %v1490_v6  ;;  %v2146_v7 = vpop.f32.mrb[54].mxu1 }
 0x230   : > { %v1505_v8 = vadd.f32 %v2146_v7, %v2552_v22  ;;  %v1499_v9 = vpop.f32.mrb[55].mxu1 }
 0x231   : > { %v1500_v10 = vadd.f32 %v2552_v22, %v1499_v9 }
 0x232   : > { %1596 = vst.msk [vmem:[%s2559_s8 + $0x1c8] sm:$0xff] %vm1538_vm2, %v1505_v8 }
 0x233   : > { %1595 = vst.msk [vmem:[%s2559_s8 + $0x1c0] sm:$0xff] %vm1538_vm2, %v1500_v10  ;;  %v2149_v11 = vpop.f32.mrb[56].mxu1 }
 0x234   : > { %v1515_v12 = vadd.f32 %v2149_v11, %v2552_v22  ;;  %v1509_v13 = vpop.f32.mrb[57].mxu1 }
 0x235   : > { %v1510_v14 = vadd.f32 %v2552_v22, %v1509_v13 }
 0x236   : > { %1598 = vst.msk [vmem:[%s2559_s8 + $0x1d8] sm:$0xff] %vm1538_vm2, %v1515_v12 }
 0x237   : > { %1597 = vst.msk [vmem:[%s2559_s8 + $0x1d0] sm:$0xff] %vm1538_vm2, %v1510_v14  ;;  %v2152_v15 = vpop.f32.mrb[58].mxu1 }
 0x238   : > { %v1525_v16 = vadd.f32 %v2152_v15, %v2552_v22  ;;  %v1519_v17 = vpop.f32.mrb[59].mxu1 }
 0x239   : > { %v1520_v19 = vadd.f32 %v2552_v22, %v1519_v17 }
 0x23a   : > { %1600 = vst.msk [vmem:[%s2559_s8 + $0x1e8] sm:$0xff] %vm1538_vm2, %v1525_v16 }
 0x23b   : > { %1599 = vst.msk [vmem:[%s2559_s8 + $0x1e0] sm:$0xff] %vm1538_vm2, %v1520_v19  ;;  %v2155_v20 = vpop.f32.mrb[60].mxu1 }
 0x23c   : > { %v1535_v21 = vadd.f32 %v2155_v20, %v2552_v22  ;;  %v1529_v18 = vpop.f32.mrb[61].mxu1 }
 0x23d   : > { %v1530_v23 = vadd.f32 %v2552_v22, %v1529_v18 }
 0x23e   : > { %1602 = vst.msk [vmem:[%s2559_s8 + $0x1f8] sm:$0xff] %vm1538_vm2, %v1535_v21 }
 0x23f   : > { %1601 = vst.msk [vmem:[%s2559_s8 + $0x1f0] sm:$0xff] %vm1538_vm2, %v1530_v23 }
 0x240 PF: > { %s15_s18 = sadd.s32 1, %s2202_s18  }
 0x241   : > { %p12_p4 = scmp.ge.s32.totalorder %s15_s18, 4  }
 0x243   :  { %14 = sbr.rel (!%p12_p4) target bundleno = 1 (0x1), region = 70 }

</bundles_post_ra>
